<compile_context>
chip_gen: v5e
topology: v5e:2x2
jax: 0.10.0
libtpu: 0.0.40
codegen_flags: <defaults>
</compile_context>

<pallas_src>
import jax
import jax.numpy as jnp
from jax.experimental import pallas as pl
from jax.experimental.pallas import tpu as pltpu

INPUT_SIZE = 70
LATENT_LENGTH = 16
HIDDEN1 = 32
HIDDEN2 = 32
HIDDEN3 = 16
HIDDEN4 = 16
BN_EPS = 1e-5
LANE = 128

# Layer dims: latent(16) -> h4(16) -> h3(16) -> h2(32) -> h1(32) -> out(70)
_DIMS = (LATENT_LENGTH, HIDDEN4, HIDDEN3, HIDDEN2, HIDDEN1, INPUT_SIZE)

# Packed weight slab: 5 blocks of (128, 128); block i occupies rows
# [i*128, (i+1)*128), real weights in rows [0:d_in) / cols [0:d_out), zero pad.
_NUM_LAYERS = 5
_W_SLAB_ROWS = _NUM_LAYERS * LANE  # 640

# Packed row-vector slab rows:
#   0/1: gamma/beta BN4, 2/3: BN3, 4/5: BN2, 6/7: BN1, 8: output bias b5.
_V_SLAB_ROWS = 16
_B5_ROW = 8

# (gamma row, beta row) for hidden layers 2..4 (layer 1 handled explicitly).
_BN_ROWS_234 = ((2, 3), (4, 5), (6, 7))


def _bn_relu(h, v_ref, g_row, b_row):
    """Training-mode BatchNorm1d fused into scale/shift, then ReLU.

    var = E[h^2] - mean^2 keeps the two reductions independent (shorter XLU
    critical path); max(., 0) guards the f32 cancellation before rsqrt.
    """
    mean = jnp.mean(h, axis=0, keepdims=True)
    mean_sq = jnp.mean(h * h, axis=0, keepdims=True)
    var = jnp.maximum(mean_sq - mean * mean, 0.0)          # biased variance
    gamma = v_ref[g_row:g_row + 1, :]
    beta = v_ref[b_row:b_row + 1, :]
    scale = gamma * jax.lax.rsqrt(var + BN_EPS)
    shift = beta - mean * scale
    return jnp.maximum(h * scale + shift, 0.0)             # fused affine + ReLU


def decoder_kernel(latent_ref, w_ref, v_ref, out_ref):
    # Layer 1: latent (B, 16) @ W1 (16, 128).  Static, sublane-aligned slice of
    # the weight ref (constant side, off the activation dependency chain).
    x = latent_ref[...]
    h = jnp.dot(x, w_ref[0:LATENT_LENGTH, :], preferred_element_type=jnp.float32)
    x = _bn_relu(h, v_ref, 0, 1)

    # Layers 2..4: full-width (B, 128) activations against full (128, 128)
    # zero-padded weight blocks -- no activation lane-slices on the serial path.
    for blk, (g_row, b_row) in enumerate(_BN_ROWS_234, start=1):
        w = w_ref[blk * LANE:(blk + 1) * LANE, :]
        h = jnp.dot(x, w, preferred_element_type=jnp.float32)
        x = _bn_relu(h, v_ref, g_row, b_row)

    # Output layer: Linear + bias + Sigmoid, stored directly as (B, 70)
    # (single masked vst; avoids a separate post-kernel XLA slice op).
    w5 = w_ref[4 * LANE:5 * LANE, :]
    b5 = v_ref[_B5_ROW:_B5_ROW + 1, :]
    logits = jnp.dot(x, w5, preferred_element_type=jnp.float32) + b5
    out_ref[...] = jax.nn.sigmoid(logits[:, :INPUT_SIZE])


def make_decoder_params(key):
    """Fresh-module-style parameters (PyTorch nn.Linear default init; BN gamma=1, beta=0)."""
    keys = jax.random.split(key, 2 * (len(_DIMS) - 1))
    weights, biases = [], []
    for i, (din, dout) in enumerate(zip(_DIMS[:-1], _DIMS[1:])):
        bound = 1.0 / (din ** 0.5)
        # Stored as (in, out): transpose of PyTorch's (out, in) weight.
        w = jax.random.uniform(keys[2 * i], (din, dout), minval=-bound, maxval=bound,
                               dtype=jnp.float32)
        b = jax.random.uniform(keys[2 * i + 1], (dout,), minval=-bound, maxval=bound,
                               dtype=jnp.float32)
        weights.append(w)
        biases.append(b)
    gammas = [jnp.ones((d,), jnp.float32) for d in (HIDDEN4, HIDDEN3, HIDDEN2, HIDDEN1)]
    betas = [jnp.zeros((d,), jnp.float32) for d in (HIDDEN4, HIDDEN3, HIDDEN2, HIDDEN1)]
    return weights, biases, gammas, betas


def pack_decoder_params(weights, biases, gammas, betas):
    """Pack all parameters into two lane-aligned VMEM slabs."""
    w_slab = jnp.zeros((_W_SLAB_ROWS, LANE), jnp.float32)
    for i, w in enumerate(weights):
        din, dout = w.shape
        w_slab = w_slab.at[i * LANE:i * LANE + din, :dout].set(w)

    v_slab = jnp.zeros((_V_SLAB_ROWS, LANE), jnp.float32)
    for i, (g, be) in enumerate(zip(gammas, betas)):
        d = g.shape[0]
        v_slab = v_slab.at[2 * i, :d].set(g)
        v_slab = v_slab.at[2 * i + 1, :d].set(be)
    # Hidden-layer biases b1..b4 are intentionally not packed: training-mode BN
    # cancels them exactly.  Only the output bias matters.
    v_slab = v_slab.at[_B5_ROW, :INPUT_SIZE].set(biases[4])
    return w_slab, v_slab


@jax.jit
def decoder_forward(latent, w_slab, v_slab):
    batch = latent.shape[0]
    vmem = pl.BlockSpec(memory_space=pltpu.MemorySpace.VMEM)
    flops = 2 * batch * sum(din * dout for din, dout in zip(_DIMS[:-1], _DIMS[1:]))
    bytes_accessed = 4 * (latent.size + w_slab.size + v_slab.size + batch * INPUT_SIZE)
    return pl.pallas_call(
        decoder_kernel,
        out_shape=jax.ShapeDtypeStruct((batch, INPUT_SIZE), jnp.float32),
        in_specs=[vmem, vmem, vmem],
        out_specs=vmem,
        cost_estimate=pl.CostEstimate(
            flops=flops,
            transcendentals=batch * INPUT_SIZE + 4 * LANE,  # sigmoid exp + BN rsqrt
            bytes_accessed=bytes_accessed,
        ),
    )(latent, w_slab, v_slab)


def decoder_reference(latent, weights, biases, gammas, betas):
    """Pure-JAX reference with the literal (bias + two-pass variance) formulation."""
    x = latent
    for i in range(4):
        h = x @ weights[i] + biases[i]
        mean = jnp.mean(h, axis=0, keepdims=True)
        var = jnp.mean((h - mean) ** 2, axis=0, keepdims=True)
        h = (h - mean) / jnp.sqrt(var + BN_EPS)
        x = jnp.maximum(h * gammas[i] + betas[i], 0.0)
    return jax.nn.sigmoid(x @ weights[4] + biases[4])


if __name__ == "__main__":
    key = jax.random.PRNGKey(0)
    k_param, k_latent = jax.random.split(key)

    weights, biases, gammas, betas = make_decoder_params(k_param)
    w_slab, v_slab = pack_decoder_params(weights, biases, gammas, betas)

    batch = 8
    latent = jax.random.normal(k_latent, (batch, LATENT_LENGTH), dtype=jnp.float32)

    out = decoder_forward(latent, w_slab, v_slab)
    out = jax.block_until_ready(out)

    assert out.shape == (batch, INPUT_SIZE), out.shape
    assert bool(jnp.all((out >= 0.0) & (out <= 1.0)))

    ref = decoder_reference(latent, weights, biases, gammas, betas)
    max_err = float(jnp.max(jnp.abs(out - ref)))
    assert max_err < 1e-4, f"mismatch vs reference: {max_err}"

    print("KERNEL_OK")
</pallas_src>

<mosaic_0001>
module attributes {stable_mosaic.version = 11 : i64} {
  func.func @decoder_kernel(%arg0: memref<8x16xf32, #tpu.memory_space<vmem>>, %arg1: memref<640x128xf32, #tpu.memory_space<vmem>>, %arg2: memref<16x128xf32, #tpu.memory_space<vmem>>, %arg3: memref<8x70xf32, #tpu.memory_space<vmem>>) attributes {dimension_semantics = [], scalar_prefetch = 0 : i64, scratch_operands = 0 : i64, tpu.core_type = #tpu.core_type<tc>} {
    %c0 = arith.constant 0 : index
    %c0_0 = arith.constant 0 : index
    %0 = vector.load %arg0[%c0, %c0_0] : memref<8x16xf32, #tpu.memory_space<vmem>>, vector<8x16xf32>
    %c0_1 = arith.constant 0 : index
    %c0_2 = arith.constant 0 : index
    %1 = vector.load %arg1[%c0_1, %c0_2] : memref<640x128xf32, #tpu.memory_space<vmem>>, vector<16x128xf32>
    %cst = arith.constant dense<0.000000e+00> : vector<8x128xf32>
    %2 = tpu.matmul %0, %1, %cst {dimension_numbers = #tpu.dot_dimension_numbers<[1], [0], [0], [1], [0, 0, 1, 1], [], []>} : vector<8x16xf32>, vector<16x128xf32>, vector<8x128xf32> -> vector<8x128xf32>
    %cst_3 = arith.constant dense<0.000000e+00> : vector<128xf32>
    %3 = vector.multi_reduction <add>, %2, %cst_3 [0] : vector<8x128xf32> to vector<128xf32>
    %4 = vector.shape_cast %3 : vector<128xf32> to vector<1x128xf32>
    %cst_4 = arith.constant 8.000000e+00 : f32
    %5 = vector.broadcast %cst_4 : f32 to vector<1x128xf32>
    %6 = arith.divf %4, %5 : vector<1x128xf32>
    %7 = arith.mulf %2, %2 : vector<8x128xf32>
    %cst_5 = arith.constant dense<0.000000e+00> : vector<128xf32>
    %8 = vector.multi_reduction <add>, %7, %cst_5 [0] : vector<8x128xf32> to vector<128xf32>
    %9 = vector.shape_cast %8 : vector<128xf32> to vector<1x128xf32>
    %cst_6 = arith.constant 8.000000e+00 : f32
    %10 = vector.broadcast %cst_6 : f32 to vector<1x128xf32>
    %11 = arith.divf %9, %10 : vector<1x128xf32>
    %12 = arith.mulf %6, %6 : vector<1x128xf32>
    %13 = arith.subf %11, %12 : vector<1x128xf32>
    %cst_7 = arith.constant 0.000000e+00 : f32
    %14 = vector.broadcast %cst_7 : f32 to vector<1x128xf32>
    %15 = arith.maximumf %13, %14 : vector<1x128xf32>
    %c0_8 = arith.constant 0 : index
    %c0_9 = arith.constant 0 : index
    %16 = vector.load %arg2[%c0_8, %c0_9] : memref<16x128xf32, #tpu.memory_space<vmem>>, vector<1x128xf32>
    %c1 = arith.constant 1 : index
    %c0_10 = arith.constant 0 : index
    %17 = vector.load %arg2[%c1, %c0_10] : memref<16x128xf32, #tpu.memory_space<vmem>>, vector<1x128xf32>
    %cst_11 = arith.constant 9.99999974E-6 : f32
    %18 = vector.broadcast %cst_11 : f32 to vector<1x128xf32>
    %19 = arith.addf %15, %18 : vector<1x128xf32>
    %20 = math.rsqrt %19 : vector<1x128xf32>
    %21 = arith.mulf %16, %20 : vector<1x128xf32>
    %22 = arith.mulf %6, %21 : vector<1x128xf32>
    %23 = arith.subf %17, %22 : vector<1x128xf32>
    %24 = vector.broadcast %21 : vector<1x128xf32> to vector<8x128xf32>
    %25 = arith.mulf %2, %24 : vector<8x128xf32>
    %26 = vector.broadcast %23 : vector<1x128xf32> to vector<8x128xf32>
    %27 = arith.addf %25, %26 : vector<8x128xf32>
    %cst_12 = arith.constant 0.000000e+00 : f32
    %28 = vector.broadcast %cst_12 : f32 to vector<8x128xf32>
    %29 = arith.maximumf %27, %28 : vector<8x128xf32>
    %c128 = arith.constant 128 : index
    %c0_13 = arith.constant 0 : index
    %30 = vector.load %arg1[%c128, %c0_13] : memref<640x128xf32, #tpu.memory_space<vmem>>, vector<128x128xf32>
    %cst_14 = arith.constant dense<0.000000e+00> : vector<8x128xf32>
    %31 = tpu.matmul %29, %30, %cst_14 {dimension_numbers = #tpu.dot_dimension_numbers<[1], [0], [0], [1], [0, 0, 1, 1], [], []>} : vector<8x128xf32>, vector<128x128xf32>, vector<8x128xf32> -> vector<8x128xf32>
    %cst_15 = arith.constant dense<0.000000e+00> : vector<128xf32>
    %32 = vector.multi_reduction <add>, %31, %cst_15 [0] : vector<8x128xf32> to vector<128xf32>
    %33 = vector.shape_cast %32 : vector<128xf32> to vector<1x128xf32>
    %cst_16 = arith.constant 8.000000e+00 : f32
    %34 = vector.broadcast %cst_16 : f32 to vector<1x128xf32>
    %35 = arith.divf %33, %34 : vector<1x128xf32>
    %36 = arith.mulf %31, %31 : vector<8x128xf32>
    %cst_17 = arith.constant dense<0.000000e+00> : vector<128xf32>
    %37 = vector.multi_reduction <add>, %36, %cst_17 [0] : vector<8x128xf32> to vector<128xf32>
    %38 = vector.shape_cast %37 : vector<128xf32> to vector<1x128xf32>
    %cst_18 = arith.constant 8.000000e+00 : f32
    %39 = vector.broadcast %cst_18 : f32 to vector<1x128xf32>
    %40 = arith.divf %38, %39 : vector<1x128xf32>
    %41 = arith.mulf %35, %35 : vector<1x128xf32>
    %42 = arith.subf %40, %41 : vector<1x128xf32>
    %cst_19 = arith.constant 0.000000e+00 : f32
    %43 = vector.broadcast %cst_19 : f32 to vector<1x128xf32>
    %44 = arith.maximumf %42, %43 : vector<1x128xf32>
    %c2 = arith.constant 2 : index
    %c0_20 = arith.constant 0 : index
    %45 = vector.load %arg2[%c2, %c0_20] : memref<16x128xf32, #tpu.memory_space<vmem>>, vector<1x128xf32>
    %c3 = arith.constant 3 : index
    %c0_21 = arith.constant 0 : index
    %46 = vector.load %arg2[%c3, %c0_21] : memref<16x128xf32, #tpu.memory_space<vmem>>, vector<1x128xf32>
    %cst_22 = arith.constant 9.99999974E-6 : f32
    %47 = vector.broadcast %cst_22 : f32 to vector<1x128xf32>
    %48 = arith.addf %44, %47 : vector<1x128xf32>
    %49 = math.rsqrt %48 : vector<1x128xf32>
    %50 = arith.mulf %45, %49 : vector<1x128xf32>
    %51 = arith.mulf %35, %50 : vector<1x128xf32>
    %52 = arith.subf %46, %51 : vector<1x128xf32>
    %53 = vector.broadcast %50 : vector<1x128xf32> to vector<8x128xf32>
    %54 = arith.mulf %31, %53 : vector<8x128xf32>
    %55 = vector.broadcast %52 : vector<1x128xf32> to vector<8x128xf32>
    %56 = arith.addf %54, %55 : vector<8x128xf32>
    %cst_23 = arith.constant 0.000000e+00 : f32
    %57 = vector.broadcast %cst_23 : f32 to vector<8x128xf32>
    %58 = arith.maximumf %56, %57 : vector<8x128xf32>
    %c256 = arith.constant 256 : index
    %c0_24 = arith.constant 0 : index
    %59 = vector.load %arg1[%c256, %c0_24] : memref<640x128xf32, #tpu.memory_space<vmem>>, vector<128x128xf32>
    %cst_25 = arith.constant dense<0.000000e+00> : vector<8x128xf32>
    %60 = tpu.matmul %58, %59, %cst_25 {dimension_numbers = #tpu.dot_dimension_numbers<[1], [0], [0], [1], [0, 0, 1, 1], [], []>} : vector<8x128xf32>, vector<128x128xf32>, vector<8x128xf32> -> vector<8x128xf32>
    %cst_26 = arith.constant dense<0.000000e+00> : vector<128xf32>
    %61 = vector.multi_reduction <add>, %60, %cst_26 [0] : vector<8x128xf32> to vector<128xf32>
    %62 = vector.shape_cast %61 : vector<128xf32> to vector<1x128xf32>
    %cst_27 = arith.constant 8.000000e+00 : f32
    %63 = vector.broadcast %cst_27 : f32 to vector<1x128xf32>
    %64 = arith.divf %62, %63 : vector<1x128xf32>
    %65 = arith.mulf %60, %60 : vector<8x128xf32>
    %cst_28 = arith.constant dense<0.000000e+00> : vector<128xf32>
    %66 = vector.multi_reduction <add>, %65, %cst_28 [0] : vector<8x128xf32> to vector<128xf32>
    %67 = vector.shape_cast %66 : vector<128xf32> to vector<1x128xf32>
    %cst_29 = arith.constant 8.000000e+00 : f32
    %68 = vector.broadcast %cst_29 : f32 to vector<1x128xf32>
    %69 = arith.divf %67, %68 : vector<1x128xf32>
    %70 = arith.mulf %64, %64 : vector<1x128xf32>
    %71 = arith.subf %69, %70 : vector<1x128xf32>
    %cst_30 = arith.constant 0.000000e+00 : f32
    %72 = vector.broadcast %cst_30 : f32 to vector<1x128xf32>
    %73 = arith.maximumf %71, %72 : vector<1x128xf32>
    %c4 = arith.constant 4 : index
    %c0_31 = arith.constant 0 : index
    %74 = vector.load %arg2[%c4, %c0_31] : memref<16x128xf32, #tpu.memory_space<vmem>>, vector<1x128xf32>
    %c5 = arith.constant 5 : index
    %c0_32 = arith.constant 0 : index
    %75 = vector.load %arg2[%c5, %c0_32] : memref<16x128xf32, #tpu.memory_space<vmem>>, vector<1x128xf32>
    %cst_33 = arith.constant 9.99999974E-6 : f32
    %76 = vector.broadcast %cst_33 : f32 to vector<1x128xf32>
    %77 = arith.addf %73, %76 : vector<1x128xf32>
    %78 = math.rsqrt %77 : vector<1x128xf32>
    %79 = arith.mulf %74, %78 : vector<1x128xf32>
    %80 = arith.mulf %64, %79 : vector<1x128xf32>
    %81 = arith.subf %75, %80 : vector<1x128xf32>
    %82 = vector.broadcast %79 : vector<1x128xf32> to vector<8x128xf32>
    %83 = arith.mulf %60, %82 : vector<8x128xf32>
    %84 = vector.broadcast %81 : vector<1x128xf32> to vector<8x128xf32>
    %85 = arith.addf %83, %84 : vector<8x128xf32>
    %cst_34 = arith.constant 0.000000e+00 : f32
    %86 = vector.broadcast %cst_34 : f32 to vector<8x128xf32>
    %87 = arith.maximumf %85, %86 : vector<8x128xf32>
    %c384 = arith.constant 384 : index
    %c0_35 = arith.constant 0 : index
    %88 = vector.load %arg1[%c384, %c0_35] : memref<640x128xf32, #tpu.memory_space<vmem>>, vector<128x128xf32>
    %cst_36 = arith.constant dense<0.000000e+00> : vector<8x128xf32>
    %89 = tpu.matmul %87, %88, %cst_36 {dimension_numbers = #tpu.dot_dimension_numbers<[1], [0], [0], [1], [0, 0, 1, 1], [], []>} : vector<8x128xf32>, vector<128x128xf32>, vector<8x128xf32> -> vector<8x128xf32>
    %cst_37 = arith.constant dense<0.000000e+00> : vector<128xf32>
    %90 = vector.multi_reduction <add>, %89, %cst_37 [0] : vector<8x128xf32> to vector<128xf32>
    %91 = vector.shape_cast %90 : vector<128xf32> to vector<1x128xf32>
    %cst_38 = arith.constant 8.000000e+00 : f32
    %92 = vector.broadcast %cst_38 : f32 to vector<1x128xf32>
    %93 = arith.divf %91, %92 : vector<1x128xf32>
    %94 = arith.mulf %89, %89 : vector<8x128xf32>
    %cst_39 = arith.constant dense<0.000000e+00> : vector<128xf32>
    %95 = vector.multi_reduction <add>, %94, %cst_39 [0] : vector<8x128xf32> to vector<128xf32>
    %96 = vector.shape_cast %95 : vector<128xf32> to vector<1x128xf32>
    %cst_40 = arith.constant 8.000000e+00 : f32
    %97 = vector.broadcast %cst_40 : f32 to vector<1x128xf32>
    %98 = arith.divf %96, %97 : vector<1x128xf32>
    %99 = arith.mulf %93, %93 : vector<1x128xf32>
    %100 = arith.subf %98, %99 : vector<1x128xf32>
    %cst_41 = arith.constant 0.000000e+00 : f32
    %101 = vector.broadcast %cst_41 : f32 to vector<1x128xf32>
    %102 = arith.maximumf %100, %101 : vector<1x128xf32>
    %c6 = arith.constant 6 : index
    %c0_42 = arith.constant 0 : index
    %103 = vector.load %arg2[%c6, %c0_42] : memref<16x128xf32, #tpu.memory_space<vmem>>, vector<1x128xf32>
    %c7 = arith.constant 7 : index
    %c0_43 = arith.constant 0 : index
    %104 = vector.load %arg2[%c7, %c0_43] : memref<16x128xf32, #tpu.memory_space<vmem>>, vector<1x128xf32>
    %cst_44 = arith.constant 9.99999974E-6 : f32
    %105 = vector.broadcast %cst_44 : f32 to vector<1x128xf32>
    %106 = arith.addf %102, %105 : vector<1x128xf32>
    %107 = math.rsqrt %106 : vector<1x128xf32>
    %108 = arith.mulf %103, %107 : vector<1x128xf32>
    %109 = arith.mulf %93, %108 : vector<1x128xf32>
    %110 = arith.subf %104, %109 : vector<1x128xf32>
    %111 = vector.broadcast %108 : vector<1x128xf32> to vector<8x128xf32>
    %112 = arith.mulf %89, %111 : vector<8x128xf32>
    %113 = vector.broadcast %110 : vector<1x128xf32> to vector<8x128xf32>
    %114 = arith.addf %112, %113 : vector<8x128xf32>
    %cst_45 = arith.constant 0.000000e+00 : f32
    %115 = vector.broadcast %cst_45 : f32 to vector<8x128xf32>
    %116 = arith.maximumf %114, %115 : vector<8x128xf32>
    %c512 = arith.constant 512 : index
    %c0_46 = arith.constant 0 : index
    %117 = vector.load %arg1[%c512, %c0_46] : memref<640x128xf32, #tpu.memory_space<vmem>>, vector<128x128xf32>
    %c8 = arith.constant 8 : index
    %c0_47 = arith.constant 0 : index
    %118 = vector.load %arg2[%c8, %c0_47] : memref<16x128xf32, #tpu.memory_space<vmem>>, vector<1x128xf32>
    %cst_48 = arith.constant dense<0.000000e+00> : vector<8x128xf32>
    %119 = tpu.matmul %116, %117, %cst_48 {dimension_numbers = #tpu.dot_dimension_numbers<[1], [0], [0], [1], [0, 0, 1, 1], [], []>} : vector<8x128xf32>, vector<128x128xf32>, vector<8x128xf32> -> vector<8x128xf32>
    %120 = vector.broadcast %118 : vector<1x128xf32> to vector<8x128xf32>
    %121 = arith.addf %119, %120 : vector<8x128xf32>
    %122 = vector.extract_strided_slice %121 {offsets = [0, 0], sizes = [8, 70], strides = [1, 1]} : vector<8x128xf32> to vector<8x70xf32>
    %123 = arith.negf %122 : vector<8x70xf32>
    %124 = math.exp %123 : vector<8x70xf32>
    %cst_49 = arith.constant 1.000000e+00 : f32
    %125 = vector.broadcast %cst_49 : f32 to vector<8x70xf32>
    %126 = arith.addf %125, %124 : vector<8x70xf32>
    %127 = arith.divf %125, %126 : vector<8x70xf32>
    %c0_50 = arith.constant 0 : index
    %c0_51 = arith.constant 0 : index
    %128 = vector.load %arg3[%c0_50, %c0_51] : memref<8x70xf32, #tpu.memory_space<vmem>>, vector<8x70xf32>
    tpu.vector_store %arg3[%c0_50, %c0_51], %127 {strides = array<i32>} : memref<8x70xf32, #tpu.memory_space<vmem>>, vector<8x70xf32>,
    return
  }
}

</mosaic_0001>

<bundles_post_ra>
// kernel: decoder_forward.1
= control target key start
LH: loop header
LB: loop body
LE: loop exit
PB: predicated region body
PF: predicated region fallthrough
CT: control target
= control target key end

     0   :  { %8 = vsyncpa [#allocation3], 0  ;;  %s610_s0 = inlined_call_operand.hbm [shape: f32[8,16], index: 0, kind: input, shape index: {}]   ;;  %s611_s1 = inlined_call_operand.hbm [shape: f32[640,128], index: 1, kind: input, shape index: {}]   ;;  %s612_s2 = inlined_call_operand.hbm [shape: f32[16,128], index: 2, kind: input, shape index: {}]   ;;  %s613_s3 = inlined_call_operand.hbm [shape: f32[8,70], index: 3, kind: output, shape index: {}]  }
   0x1   :  { %9 = vsyncpa [#allocation6], 0  ;;  %s26_s14 = sshll.u32 %s611_s1, 4  ;;  %s27_s14 = int_to_ptr.hbm [resolvable:$true] %s26_s14 }
   0x2   :  { %10 = vsyncpa [#allocation4], 0  ;;  %s561_s15 = smov [#allocation5]   ;;  %s16_s19 = sshll.u32 %s610_s0, 4  ;;  %s17_s19 = int_to_ptr.hbm [resolvable:$true] %s16_s19 }
   0x3   :  { %s28_s16 = sshll.u32 %s561_s15, 4  ;;  %s562_s20 = smov 128   ;;  %s29_s16 = int_to_ptr.vmem [resolvable:$true] %s28_s16 }
   0x4   :  { %s563_s21 = smov 8   ;;  %s564_s22 = smov [#allocation2]  }
   0x5   :  { %34 = dma.hbm_to_vmem [thread:$0]  %s27_s14, 10240, %s29_s16, [#allocation6], %s562_s20, %s562_s20, %s563_s21  }
   0x6   :  { %s18_s23 = sshll.u32 %s564_s22, 4  ;;  %s39_s26 = sshll.u32 %s612_s2, 4  ;;  %s19_s23 = int_to_ptr.vmem [resolvable:$true] %s18_s23  ;;  %s40_s26 = int_to_ptr.hbm [resolvable:$true] %s39_s26 }
   0x7   :  { %21 = dma.hbm_to_vmem [thread:$0]  %s17_s19, 128, %s19_s23, [#allocation3]  }
   0x8   :  { %s565_s1 = smov [#allocation7]  }
   0x9   :  { %s41_s27 = sshll.u32 %s565_s1, 4  ;;  %s42_s27 = int_to_ptr.vmem [resolvable:$true] %s41_s27 }
   0xa   :  { %47 = dma.hbm_to_vmem [thread:$0]  %s40_s26, 256, %s42_s27, [#allocation6], %s562_s20, %s562_s20, %s563_s21  }
   0xb   :  { %555 = dma.done.wait [#allocation3], 128  }
   0xc   :  { %556 = vsyncadd [#allocation3], 4294967168 }
   0xd   :  { %557 = dma.done.wait [#allocation6], 10496  }
   0xe   :  { %558 = vsyncadd [#allocation6], 4294956800  ;;  %v62_v0 = vld [vmem:[#allocation5 + $0x8] sm:$0xff]  ;;  %v61_v1 = vld [vmem:[#allocation5] sm:$0xff]  ;;  %vm63_vm0 = vcmask 130048   ;;  %v566_v5 = vmov 8.0  }
   0xf   :  { %81 = vmatpush.msra.mxu0 %v62_v0  ;;  %v60_v2 = vld [vmem:[#allocation2] sm:$0xff]  ;;  %v147_v4 = vld [vmem:[#allocation5 + $0xf0] sm:$0xff]  ;;  %445 = vrcp.f32 %v566_v5  ;;  %v146_v6 = vld [vmem:[#allocation5 + $0xe8] sm:$0xff]  ;;  %s567_s0 = smov [#allocation8]   ;;  %s424_s30 = sshll.u32 %s613_s3, 4  ;;  %s425_s30 = int_to_ptr.hbm [resolvable:$true] %s424_s30 }
  0x10   :  { %v148_v3 = vld [vmem:[#allocation5 + $0xf8] sm:$0xff]  ;;  %v145_v7 = vld [vmem:[#allocation5 + $0xe0] sm:$0xff]  ;;  %v143_v10 = vld [vmem:[#allocation5 + $0xd0] sm:$0xff]  ;;  %s422_s2 = sshll.u32 %s567_s0, 4  ;;  %s423_s2 = int_to_ptr.vmem [resolvable:$true] %s422_s2 }
  0x11   :  { %82 = vmatpush.msra.mxu0 %v61_v1  ;;  %149 = vmatpush.msra.mxu1 %v148_v3  ;;  %v144_v8 = vld [vmem:[#allocation5 + $0xd8] sm:$0xff]  ;;  %v142_v11 = vld [vmem:[#allocation5 + $0xc8] sm:$0xff]  ;;  %v141_v13 = vld [vmem:[#allocation5 + $0xc0] sm:$0xff] }
  0x12   :  { %435 = vmatmul.msk.f32.vlgmr.msra.gmra.mxu0 %vm63_vm0, %v60_v2  ;;  %v140_v14 = vld [vmem:[#allocation5 + $0xb8] sm:$0xff]  ;;  %v139_v16 = vld [vmem:[#allocation5 + $0xb0] sm:$0xff]  ;;  %v138_v20 = vld [vmem:[#allocation5 + $0xa8] sm:$0xff] }
  0x13   :  { %150 = vmatpush.msra.mxu1 %v147_v4  ;;  %v137_v24 = vld [vmem:[#allocation5 + $0xa0] sm:$0xff]  ;;  %v136_v27 = vld [vmem:[#allocation5 + $0x98] sm:$0xff]  ;;  %v135_v31 = vld [vmem:[#allocation5 + $0x90] sm:$0xff] }
  0x14   :  { %v134_v34 = vld [vmem:[#allocation5 + $0x88] sm:$0xff]  ;;  %v133_v38 = vld [vmem:[#allocation5 + $0x80] sm:$0xff]  ;;  %v223_v63 = vld [vmem:[#allocation5 + $0x178] sm:$0xff] }
  0x15   :  { %151 = vmatpush.msra.mxu1 %v146_v6  ;;  %v446_v9 = vpop.eup %445  ;;  %v112_v51 = vld [vmem:[#allocation7] sm:$0x1]  ;;  %v113_v55 = vld [vmem:[#allocation7 + $0x1] sm:$0x1]  ;;  %224 = vmatpush.msra.mxu2 %v223_v63  ;;  %v222_v0 = vld [vmem:[#allocation5 + $0x170] sm:$0xff] }
  0x16   :  { %v94_v12 = vmul.f32 8.0, %v446_v9  ;;  %vm98_vm1 = vweird.f32 %v446_v9  ;;  %v221_v1 = vld [vmem:[#allocation5 + $0x168] sm:$0xff]  ;;  %v220_v2 = vld [vmem:[#allocation5 + $0x160] sm:$0xff]  ;;  %v219_v3 = vld [vmem:[#allocation5 + $0x158] sm:$0xff] }
  0x17   :  { %152 = vmatpush.msra.mxu1 %v145_v7  ;;  %225 = vmatpush.msra.mxu2 %v222_v0  ;;  %v218_v4 = vld [vmem:[#allocation5 + $0x150] sm:$0xff] }
  0x18   :  { %v95_v15 = vsub.f32 1.0, %v94_v12 }
  0x19   :  { %153 = vmatpush.msra.mxu1 %v144_v8  ;;  %226 = vmatpush.msra.mxu2 %v221_v1  ;;  %v217_v8 = vld [vmem:[#allocation5 + $0x148] sm:$0xff]  ;;  %v291_v1 = vld [vmem:[#allocation5 + $0x1c0] sm:$0xff] }
  0x1a   :  { %v96_v21 = vmul.f32 %v446_v9, %v95_v15 }
  0x1b   :  { %154 = vmatpush.msra.mxu1 %v143_v10  ;;  %227 = vmatpush.msra.mxu2 %v220_v2 }
  0x1c   :  { %v97_v28 = vadd.f32 %v446_v9, %v96_v21 }
  0x1d   :  { %155 = vmatpush.msra.mxu1 %v142_v11  ;;  %228 = vmatpush.msra.mxu2 %v219_v3  ;;  %v216_v11 = vld [vmem:[#allocation5 + $0x140] sm:$0xff] }
  0x1e   :  { %v597_v35 = vsel %vm98_vm1, %v446_v9, %v97_v28  ;;  %vm415_vm1 = vcmask 572416  }
  0x1f   :  { %156 = vmatpush.msra.mxu1 %v141_v13  ;;  %229 = vmatpush.msra.mxu2 %v218_v4  ;;  %v290_v4 = vld [vmem:[#allocation5 + $0x1b8] sm:$0xff] }
  0x21   :  { %157 = vmatpush.msra.mxu1 %v140_v14  ;;  %230 = vmatpush.msra.mxu2 %v217_v8  ;;  %v215_v14 = vld [vmem:[#allocation5 + $0x138] sm:$0xff] }
  0x23   :  { %158 = vmatpush.msra.mxu1 %v139_v16  ;;  %231 = vmatpush.msra.mxu2 %v216_v11 }
  0x25   :  { %159 = vmatpush.msra.mxu1 %v138_v20  ;;  %232 = vmatpush.msra.mxu2 %v215_v14  ;;  %v213_v20 = vld [vmem:[#allocation5 + $0x128] sm:$0xff] }
  0x27   :  { %160 = vmatpush.msra.mxu1 %v137_v24 }
  0x29   :  { %161 = vmatpush.msra.mxu1 %v136_v27  ;;  %v210_v27 = vld [vmem:[#allocation5 + $0x110] sm:$0xff] }
  0x2b   :  { %162 = vmatpush.msra.mxu1 %v135_v31 }
  0x2d   :  { %163 = vmatpush.msra.mxu1 %v134_v34 }
  0x2f   :  { %164 = vmatpush.msra.mxu1 %v133_v38 }
  0x8f   :  { %v84_v17 = vpop.f32.mrf.mxu0 }
  0x90   :  { %v87_v18 = vrot.slane %v84_v17, 4  ;;  %v101_v19 = vmul.f32 %v84_v17, %v84_v17 }
  0x92   :  { %v88_v22 = vadd.f32 %v87_v18, %v84_v17  ;;  %v102_v23 = vrot.slane %v101_v19, 4 }
  0x94   :  { %v89_v25 = vrot.slane %v88_v22, 2  ;;  %v103_v26 = vadd.f32 %v102_v23, %v101_v19  ;;  %v212_v23 = vld [vmem:[#allocation5 + $0x120] sm:$0xff] }
  0x96   :  { %v90_v29 = vadd.f32 %v89_v25, %v88_v22  ;;  %v104_v30 = vrot.slane %v103_v26, 2 }
  0x98   :  { %v91_v32 = vrot.slane %v90_v29, 1  ;;  %v105_v33 = vadd.f32 %v104_v30, %v103_v26  ;;  %v211_v26 = vld [vmem:[#allocation5 + $0x118] sm:$0xff]  ;;  %v209_v30 = vld [vmem:[#allocation5 + $0x108] sm:$0xff] }
  0x9a   :  { %v92_v36 = vadd.f32 %v91_v32, %v90_v29  ;;  %v106_v37 = vrot.slane %v105_v33, 1  ;;  %v208_v32 = vld [vmem:[#allocation5 + $0x100] sm:$0xff] }
  0x9c   :  { %v107_v39 = vadd.f32 %v106_v37, %v105_v33  ;;  %v100_v40 = vmul.f32 %v597_v35, %v92_v36 }
  0x9e   :  { %v108_v41 = vmul.f32 %v107_v39, %v597_v35  ;;  %v109_v42 = vmul.f32 %v100_v40, %v100_v40 }
  0xa0   :  { %v110_v43 = vsub.f32 %v108_v41, %v109_v42  ;;  %v187_v41 = vld [vmem:[#allocation7 + $0x2] sm:$0x1] }
  0xa2   :  { %v111_v44 = vmax.f32 %v110_v43, 0.0 }
  0xa4   :  { %v114_v45 = vadd.f32 1e-05, %v111_v44 }
  0xa6   :  { %447 = vrsqrt.f32 %v114_v45  ;;  %vm121_vm3 = vweird.f32 %v114_v45 }
  0xac   :  { %v448_v46 = vpop.eup %447 }
  0xad   :  { %v116_v47 = vmul.f32 %v448_v46, %v114_v45  ;;  %vm122_vm2 = vweird.f32 %v448_v46  ;;  %v188_v45 = vld [vmem:[#allocation7 + $0x3] sm:$0x1] }
  0xae   :  { %vm123_vm4 = vmor %vm121_vm3, %vm122_vm2 }
  0xaf   :  { %v117_v48 = vmul.f32 %v448_v46, %v116_v47 }
  0xb1   :  { %v118_v49 = vmul.f32 0.5, %v117_v48 }
  0xb3   :  { %v119_v50 = vsub.f32 1.5, %v118_v49 }
  0xb5   :  { %v120_v52 = vmul.f32 %v448_v46, %v119_v50 }
  0xb7   :  { %v124_v53 = vsel %vm123_vm4, %v448_v46, %v120_v52 }
  0xb8   :  { %v125_v54 = vmul.f32 %v124_v53, %v112_v51  ;;  %v298_v53 = vld [vmem:[#allocation5 + $0x1f8] sm:$0xff] }
  0xb9   :  { %299 = vmatpush.msra.mxu3 %v298_v53 }
  0xba   :  { %v126_v56 = vmul.f32 %v125_v54, %v100_v40  ;;  %v128_v57 = vperm.slane %v125_v54, 0  ;;  %v297_v54 = vld [vmem:[#allocation5 + $0x1f0] sm:$0xff] }
  0xbb   :  { %300 = vmatpush.msra.mxu3 %v297_v54 }
  0xbc   :  { %v127_v58 = vsub.f32 %v113_v55, %v126_v56  ;;  %v129_v59 = vmul.f32 %v128_v57, %v84_v17  ;;  %v214_v17 = vld [vmem:[#allocation5 + $0x130] sm:$0xff]  ;;  %v296_v55 = vld [vmem:[#allocation5 + $0x1e8] sm:$0xff]  ;;  %v295_v56 = vld [vmem:[#allocation5 + $0x1e0] sm:$0xff] }
  0xbd   :  { %233 = vmatpush.msra.mxu2 %v214_v17  ;;  %301 = vmatpush.msra.mxu3 %v296_v55  ;;  %v294_v57 = vld [vmem:[#allocation5 + $0x1d8] sm:$0xff]  ;;  %v285_v17 = vld [vmem:[#allocation5 + $0x190] sm:$0xff]  ;;  %v366_v55 = vld [vmem:[#allocation5 + $0x240] sm:$0xff] }
  0xbe   :  { %v130_v60 = vperm.slane %v127_v58, 0  ;;  %v293_v58 = vld [vmem:[#allocation5 + $0x1d0] sm:$0xff] }
  0xbf   :  { %234 = vmatpush.msra.mxu2 %v213_v20  ;;  %302 = vmatpush.msra.mxu3 %v295_v56  ;;  %v284_v20 = vld [vmem:[#allocation5 + $0x188] sm:$0xff] }
  0xc0   :  { %v131_v61 = vadd.f32 %v130_v60, %v129_v59 }
  0xc1   :  { %235 = vmatpush.msra.mxu2 %v212_v23  ;;  %303 = vmatpush.msra.mxu3 %v294_v57 }
  0xc2   :  { %v132_v62 = vmax.f32 %v131_v61, 0.0 }
  0xc3   :  { %236 = vmatpush.msra.mxu2 %v211_v26  ;;  %304 = vmatpush.msra.mxu3 %v293_v58  ;;  %v365_v58 = vld [vmem:[#allocation5 + $0x238] sm:$0xff] }
  0xc4   :  { %165 = vmatmul.f32.vlgmr.msra.gmra.mxu1 %v132_v62  ;;  %v292_v62 = vld [vmem:[#allocation5 + $0x1c8] sm:$0xff] }
  0xc5   :  { %237 = vmatpush.msra.mxu2 %v210_v27  ;;  %305 = vmatpush.msra.mxu3 %v292_v62 }
  0xc7   :  { %238 = vmatpush.msra.mxu2 %v209_v30  ;;  %306 = vmatpush.msra.mxu3 %v291_v1  ;;  %v262_v30 = vld [vmem:[#allocation7 + $0x4] sm:$0x1] }
  0xc9   :  { %239 = vmatpush.msra.mxu2 %v208_v32  ;;  %307 = vmatpush.msra.mxu3 %v290_v4 }
 0x141   :  { %v166_v5 = vpop.f32.mrf.mxu1 }
 0x142   :  { %v169_v6 = vrot.slane %v166_v5, 4  ;;  %v176_v7 = vmul.f32 %v166_v5, %v166_v5 }
 0x144   :  { %v170_v9 = vadd.f32 %v169_v6, %v166_v5  ;;  %v177_v10 = vrot.slane %v176_v7, 4 }
 0x146   :  { %v171_v12 = vrot.slane %v170_v9, 2  ;;  %v178_v13 = vadd.f32 %v177_v10, %v176_v7  ;;  %v289_v7 = vld [vmem:[#allocation5 + $0x1b0] sm:$0xff]  ;;  %v288_v10 = vld [vmem:[#allocation5 + $0x1a8] sm:$0xff] }
 0x147   :  { %308 = vmatpush.msra.mxu3 %v289_v7  ;;  %v360_v7 = vld [vmem:[#allocation5 + $0x210] sm:$0xff] }
 0x148   :  { %v172_v15 = vadd.f32 %v171_v12, %v170_v9  ;;  %v179_v16 = vrot.slane %v178_v13, 2 }
 0x149   :  { %309 = vmatpush.msra.mxu3 %v288_v10  ;;  %v359_v10 = vld [vmem:[#allocation5 + $0x208] sm:$0xff] }
 0x14a   :  { %v173_v18 = vrot.slane %v172_v15, 1  ;;  %v180_v19 = vadd.f32 %v179_v16, %v178_v13  ;;  %v287_v13 = vld [vmem:[#allocation5 + $0x1a0] sm:$0xff]  ;;  %v286_v16 = vld [vmem:[#allocation5 + $0x198] sm:$0xff] }
 0x14b   :  { %310 = vmatpush.msra.mxu3 %v287_v13 }
 0x14c   :  { %v174_v21 = vadd.f32 %v173_v18, %v172_v15  ;;  %v181_v22 = vrot.slane %v180_v19, 1 }
 0x14d   :  { %311 = vmatpush.msra.mxu3 %v286_v16 }
 0x14e   :  { %v175_v24 = vmul.f32 %v174_v21, %v597_v35  ;;  %v182_v25 = vadd.f32 %v181_v22, %v180_v19  ;;  %v283_v22 = vld [vmem:[#allocation5 + $0x180] sm:$0xff] }
 0x14f   :  { %312 = vmatpush.msra.mxu3 %v285_v17 }
 0x150   :  { %v183_v28 = vmul.f32 %v182_v25, %v597_v35  ;;  %v184_v29 = vmul.f32 %v175_v24, %v175_v24 }
 0x151   :  { %313 = vmatpush.msra.mxu3 %v284_v20  ;;  %v337_v20 = vld [vmem:[#allocation7 + $0x6] sm:$0x1] }
 0x152   :  { %v185_v31 = vsub.f32 %v183_v28, %v184_v29 }
 0x153   :  { %314 = vmatpush.msra.mxu3 %v283_v22 }
 0x154   :  { %v186_v33 = vmax.f32 %v185_v31, 0.0 }
 0x156   :  { %v189_v34 = vadd.f32 1e-05, %v186_v33 }
 0x158   :  { %449 = vrsqrt.f32 %v189_v34  ;;  %vm196_vm6 = vweird.f32 %v189_v34 }
 0x15e   :  { %v450_v36 = vpop.eup %449 }
 0x15f   :  { %v191_v37 = vmul.f32 %v450_v36, %v189_v34  ;;  %vm197_vm5 = vweird.f32 %v450_v36  ;;  %v263_v34 = vld [vmem:[#allocation7 + $0x5] sm:$0x1] }
 0x160   :  { %vm198_vm7 = vmor %vm196_vm6, %vm197_vm5 }
 0x161   :  { %v192_v38 = vmul.f32 %v450_v36, %v191_v37 }
 0x163   :  { %v193_v39 = vmul.f32 0.5, %v192_v38 }
 0x165   :  { %v194_v40 = vsub.f32 1.5, %v193_v39 }
 0x167   :  { %v195_v42 = vmul.f32 %v450_v36, %v194_v40 }
 0x169   :  { %v199_v43 = vsel %vm198_vm7, %v450_v36, %v195_v42 }
 0x16a   :  { %v200_v44 = vmul.f32 %v199_v43, %v187_v41  ;;  %v373_v43 = vld [vmem:[#allocation5 + $0x278] sm:$0xff] }
 0x16b   :  { %376 = vmatpush.msrb.mxu0 %v373_v43 }
 0x16c   :  { %v203_v46 = vperm.slane %v200_v44, 0  ;;  %v201_v47 = vmul.f32 %v200_v44, %v175_v24  ;;  %v372_v44 = vld [vmem:[#allocation5 + $0x270] sm:$0xff] }
 0x16d   :  { %377 = vmatpush.msrb.mxu0 %v372_v44 }
 0x16e   :  { %v202_v48 = vsub.f32 %v188_v45, %v201_v47  ;;  %v204_v49 = vmul.f32 %v203_v46, %v166_v5  ;;  %v371_v45 = vld [vmem:[#allocation5 + $0x268] sm:$0xff]  ;;  %v370_v46 = vld [vmem:[#allocation5 + $0x260] sm:$0xff]  ;;  %v369_v47 = vld [vmem:[#allocation5 + $0x258] sm:$0xff] }
 0x16f   :  { %378 = vmatpush.msrb.mxu0 %v371_v45 }
 0x170   :  { %v205_v50 = vperm.slane %v202_v48, 0  ;;  %v368_v48 = vld [vmem:[#allocation5 + $0x250] sm:$0xff] }
 0x171   :  { %379 = vmatpush.msrb.mxu0 %v370_v46 }
 0x172   :  { %v206_v51 = vadd.f32 %v205_v50, %v204_v49 }
 0x173   :  { %380 = vmatpush.msrb.mxu0 %v369_v47 }
 0x174   :  { %v207_v52 = vmax.f32 %v206_v51, 0.0 }
 0x175   :  { %381 = vmatpush.msrb.mxu0 %v368_v48 }
 0x176   :  { %240 = vmatmul.f32.vlgmr.msra.gmra.mxu2 %v207_v52  ;;  %v367_v52 = vld [vmem:[#allocation5 + $0x248] sm:$0xff] }
 0x177   :  { %382 = vmatpush.msrb.mxu0 %v367_v52 }
 0x179   :  { %383 = vmatpush.msrb.mxu0 %v366_v55 }
 0x17b   :  { %384 = vmatpush.msrb.mxu0 %v365_v58 }
 0x1f9   :  { %v241_v59 = vpop.f32.mrf.mxu2 }
 0x1fa   :  { %v244_v60 = vrot.slane %v241_v59, 4  ;;  %v251_v61 = vmul.f32 %v241_v59, %v241_v59 }
 0x1fc   :  { %v245_v63 = vadd.f32 %v244_v60, %v241_v59  ;;  %v252_v0 = vrot.slane %v251_v61, 4 }
 0x1fe   :  { %v246_v2 = vrot.slane %v245_v63, 2  ;;  %v253_v3 = vadd.f32 %v252_v0, %v251_v61  ;;  %v364_v61 = vld [vmem:[#allocation5 + $0x230] sm:$0xff]  ;;  %v363_v0 = vld [vmem:[#allocation5 + $0x228] sm:$0xff] }
 0x1ff   :  { %385 = vmatpush.msrb.mxu0 %v364_v61 }
 0x200   :  { %v247_v5 = vadd.f32 %v246_v2, %v245_v63  ;;  %v254_v6 = vrot.slane %v253_v3, 2 }
 0x201   :  { %386 = vmatpush.msrb.mxu0 %v363_v0 }
 0x202   :  { %v248_v8 = vrot.slane %v247_v5, 1  ;;  %v255_v9 = vadd.f32 %v254_v6, %v253_v3  ;;  %v362_v3 = vld [vmem:[#allocation5 + $0x220] sm:$0xff]  ;;  %v361_v6 = vld [vmem:[#allocation5 + $0x218] sm:$0xff] }
 0x203   :  { %387 = vmatpush.msrb.mxu0 %v362_v3 }
 0x204   :  { %v249_v11 = vadd.f32 %v248_v8, %v247_v5  ;;  %v256_v12 = vrot.slane %v255_v9, 1 }
 0x205   :  { %388 = vmatpush.msrb.mxu0 %v361_v6 }
 0x206   :  { %v250_v14 = vmul.f32 %v249_v11, %v597_v35  ;;  %v257_v15 = vadd.f32 %v256_v12, %v255_v9  ;;  %v358_v12 = vld [vmem:[#allocation5 + $0x200] sm:$0xff] }
 0x207   :  { %389 = vmatpush.msrb.mxu0 %v360_v7 }
 0x208   :  { %v258_v18 = vmul.f32 %v257_v15, %v597_v35  ;;  %v259_v19 = vmul.f32 %v250_v14, %v250_v14 }
 0x209   :  { %390 = vmatpush.msrb.mxu0 %v359_v10 }
 0x20a   :  { %v260_v21 = vsub.f32 %v258_v18, %v259_v19 }
 0x20b   :  { %391 = vmatpush.msrb.mxu0 %v358_v12 }
 0x20c   :  { %v261_v23 = vmax.f32 %v260_v21, 0.0 }
 0x20e   :  { %v264_v24 = vadd.f32 1e-05, %v261_v23  ;;  %v338_v23 = vld [vmem:[#allocation7 + $0x7] sm:$0x1] }
 0x210   :  { %451 = vrsqrt.f32 %v264_v24  ;;  %vm271_vm9 = vweird.f32 %v264_v24 }
 0x216   :  { %v452_v25 = vpop.eup %451 }
 0x217   :  { %v266_v26 = vmul.f32 %v452_v25, %v264_v24  ;;  %vm272_vm8 = vweird.f32 %v452_v25 }
 0x218   :  { %vm273_vm10 = vmor %vm271_vm9, %vm272_vm8 }
 0x219   :  { %v267_v27 = vmul.f32 %v452_v25, %v266_v26 }
 0x21b   :  { %v268_v28 = vmul.f32 0.5, %v267_v27 }
 0x21d   :  { %v269_v29 = vsub.f32 1.5, %v268_v28 }
 0x21f   :  { %v270_v31 = vmul.f32 %v452_v25, %v269_v29 }
 0x221   :  { %v274_v32 = vsel %vm273_vm10, %v452_v25, %v270_v31  ;;  %v444_v31 = vld [vmem:[#allocation7 + $0x8] ss:$0 sm:$0xff] }
 0x222   :  { %v275_v33 = vmul.f32 %v274_v32, %v262_v30 }
 0x224   :  { %v278_v36 = vperm.slane %v275_v33, 0  ;;  %v276_v37 = vmul.f32 %v275_v33, %v250_v14 }
 0x226   :  { %v277_v38 = vsub.f32 %v263_v34, %v276_v37  ;;  %v279_v39 = vmul.f32 %v278_v36, %v241_v59 }
 0x228   :  { %v280_v40 = vperm.slane %v277_v38, 0 }
 0x22a   :  { %v281_v41 = vadd.f32 %v280_v40, %v279_v39 }
 0x22c   :  { %v282_v42 = vmax.f32 %v281_v41, 0.0 }
 0x22e   :  { %315 = vmatmul.f32.vlgmr.msra.gmra.mxu3 %v282_v42 }
 0x2b1   :  { %v316_v49 = vpop.f32.mrf.mxu3 }
 0x2b2   :  { %v319_v50 = vrot.slane %v316_v49, 4  ;;  %v326_v51 = vmul.f32 %v316_v49, %v316_v49 }
 0x2b4   :  { %v320_v53 = vadd.f32 %v319_v50, %v316_v49  ;;  %v327_v54 = vrot.slane %v326_v51, 4 }
 0x2b6   :  { %v321_v56 = vrot.slane %v320_v53, 2  ;;  %v328_v57 = vadd.f32 %v327_v54, %v326_v51 }
 0x2b8   :  { %v322_v59 = vadd.f32 %v321_v56, %v320_v53  ;;  %v329_v60 = vrot.slane %v328_v57, 2 }
 0x2ba   :  { %v323_v62 = vrot.slane %v322_v59, 1  ;;  %v330_v63 = vadd.f32 %v329_v60, %v328_v57 }
 0x2bc   :  { %v324_v1 = vadd.f32 %v323_v62, %v322_v59  ;;  %v331_v2 = vrot.slane %v330_v63, 1 }
 0x2be   :  { %v325_v4 = vmul.f32 %v324_v1, %v597_v35  ;;  %v332_v5 = vadd.f32 %v331_v2, %v330_v63 }
 0x2c0   :  { %v333_v8 = vmul.f32 %v332_v5, %v597_v35  ;;  %v334_v9 = vmul.f32 %v325_v4, %v325_v4 }
 0x2c2   :  { %v335_v11 = vsub.f32 %v333_v8, %v334_v9 }
 0x2c4   :  { %v336_v13 = vmax.f32 %v335_v11, 0.0 }
 0x2c6   :  { %v339_v14 = vadd.f32 1e-05, %v336_v13 }
 0x2c8   :  { %453 = vrsqrt.f32 %v339_v14  ;;  %vm346_vm12 = vweird.f32 %v339_v14 }
 0x2ce   :  { %v454_v15 = vpop.eup %453 }
 0x2cf   :  { %v341_v16 = vmul.f32 %v454_v15, %v339_v14  ;;  %vm347_vm11 = vweird.f32 %v454_v15 }
 0x2d0   :  { %vm348_vm13 = vmor %vm346_vm12, %vm347_vm11 }
 0x2d1   :  { %v342_v17 = vmul.f32 %v454_v15, %v341_v16 }
 0x2d3   :  { %v343_v18 = vmul.f32 0.5, %v342_v17 }
 0x2d5   :  { %v344_v19 = vsub.f32 1.5, %v343_v18 }
 0x2d7   :  { %v345_v21 = vmul.f32 %v454_v15, %v344_v19 }
 0x2d9   :  { %v349_v35 = vsel %vm348_vm13, %v454_v15, %v345_v21 }
 0x2da   :  { %v350_v22 = vmul.f32 %v349_v35, %v337_v20 }
 0x2dc   :  { %v353_v24 = vperm.slane %v350_v22, 0  ;;  %v351_v25 = vmul.f32 %v350_v22, %v325_v4 }
 0x2de   :  { %v352_v26 = vsub.f32 %v338_v23, %v351_v25  ;;  %v354_v27 = vmul.f32 %v353_v24, %v316_v49 }
 0x2e0   :  { %v355_v28 = vperm.slane %v352_v26, 0 }
 0x2e2   :  { %v356_v29 = vadd.f32 %v355_v28, %v354_v27 }
 0x2e4   :  { %v357_v30 = vmax.f32 %v356_v29, 0.0 }
 0x2e6   :  { %392 = vmatmul.f32.vlgmr.msrb.gmra.mxu0 %v357_v30 }
 0x363   :  { %v393_v32 = vpop.f32.mrf.mxu0 }
 0x364   :  { %v394_v33 = vadd.f32 %v444_v31, %v393_v32 }
 0x366   :  { %v436_v34 = vmul.f32 -1.442695, %v394_v33 }
 0x368   :  { %455 = vpow2.f32 %v436_v34 }
 0x36e   :  { %v456_v36 = vpop.eup %455 }
 0x36f   :  { %v399_v37 = vadd.f32 1.0, %v456_v36 }
 0x371   :  { %457 = vrcp.f32 %v399_v37  ;;  %v411_v41 = vand.u32 2147483648, %v399_v37  ;;  %v409_v43 = vand.u32 2147483647, %v399_v37  ;;  %vm405_vm15 = vweird.f32 %v399_v37 }
 0x373   :  { %v412_v45 = vor.u32 1.1754944e-38, %v411_v41  ;;  %vm410_vm2 = vcmp.eq.f32.partialorder %v409_v43, 8.507059e+37 }
 0x377   :  { %v458_v38 = vpop.eup %457 }
 0x378   :  { %v401_v39 = vmul.f32 %v458_v38, %v399_v37  ;;  %vm406_vm14 = vweird.f32 %v458_v38 }
 0x379   :  { %vm407_vm0 = vmor %vm405_vm15, %vm406_vm14 }
 0x37a   :  { %v402_v40 = vsub.f32 1.0, %v401_v39 }
 0x37c   :  { %v403_v42 = vmul.f32 %v458_v38, %v402_v40 }
 0x37e   :  { %v404_v44 = vadd.f32 %v458_v38, %v403_v42 }
 0x380   :  { %v408_v46 = vsel %vm407_vm0, %v458_v38, %v404_v44 }
 0x381   :  { %v413_v47 = vsel %vm410_vm2, %v412_v45, %v408_v46 }
 0x382   :  { %416 = vst.msk [vmem:[#allocation8] sm:$0xff] %vm415_vm1, %v413_v47 }
 0x383   :  { %427 = dma.vmem_to_hbm [thread:$0]  %s423_s2, 128, %s425_s30, [#allocation4]  }
 0x384   :  { %559 = dma.done.wait [#allocation4], 128  }
 0x385   :  { %560 = vsyncadd [#allocation4], 4294967168 }
 0x386   :  { %432 = vsyncpa [#allocation3], 1 }
 0x387   :  { %433 = vsyncpa [#allocation6], 1 }
 0x388   :  { %434 = vsyncpa [#allocation4], 1 }

</bundles_post_ra>
